<compile_context>
chip_gen: v7x
topology: tpu7x:2x2x1
jax: 0.10.0
libtpu: 0.0.40
codegen_flags: <defaults>
</compile_context>

<pallas_src>
import jax
import jax.numpy as jnp
import numpy as np
from jax.experimental import pallas as pl
from jax.experimental.pallas import tpu as pltpu


def _round_up(x, m):
    return (x + m - 1) // m * m


def policy_kernel(x_ref, cw_ref, fcw_ref, fcb_ref, shift_ref, out_ref):
    # x_ref    : (TN, C, HW)   f32   input activation tile
    # cw_ref   : (C, 1)        f32   1x1-conv weight with BN scale folded in
    # fcw_ref  : (HW, P_pad)   f32   fc weight (transposed, lane-padded)
    # fcb_ref  : (1, P_pad)    f32   fc bias (padded cols = -1e30)
    # shift_ref: (1,)          f32   SMEM scalar: folded conv-bias + BN shift
    # out_ref  : (TN, P_pad)   f32   softmax probabilities (padded cols ~ 0)
    x = x_ref[...]                                    # (TN, C, HW)
    cw = cw_ref[...]                                  # (C, 1)
    shift = shift_ref[0]

    # 1x1 conv with a single output channel (BN scale pre-folded into cw),
    # then folded BN shift + ReLU.
    h = jnp.sum(x * cw[None, :, :], axis=1) + shift   # (TN, HW)
    h = jnp.maximum(h, 0.0)

    # Fully-connected layer on the MXU (lane-dense padded output).
    logits = (
        jnp.dot(h, fcw_ref[...], preferred_element_type=jnp.float32)
        + fcb_ref[...]
    )                                                 # (TN, P_pad)

    # logsoftmax(x).exp() == softmax(x) (numerically stable form).
    m = jnp.max(logits, axis=-1, keepdims=True)
    e = jnp.exp(logits - m)
    denom = jnp.sum(e, axis=-1, keepdims=True)
    out_ref[...] = e * pl.reciprocal(denom, approx=True)


def policy_net_forward(x, params):
    """x: (N, C, H, W) float32, NCHW as in PyTorch. Returns (N, outplanes)."""
    N, C, H, W = x.shape
    HW = H * W
    P = int(params["outplanes"])
    assert HW == P - 1, "PolicyNet.forward requires H*W == outplanes - 1"

    # ---- padding / tiling decisions -------------------------------------
    P_pad = _round_up(P, 128)                 # lane-dense output columns
    if N >= 256:
        TN = 256                              # streaming batch tile
    else:
        TN = _round_up(max(N, 1), 8)          # single tile, sublane aligned
    N_pad = _round_up(N, TN)
    grid = (N_pad // TN,)

    # ---- operand preparation --------------------------------------------
    x3 = x.reshape(N, C, HW).astype(jnp.float32)
    if N_pad != N:
        x3 = jnp.pad(x3, ((0, N_pad - N), (0, 0), (0, 0)))

    # Fold conv bias + BatchNorm (eval mode) into the conv weight & a shift.
    scale = params["bn_gamma"] / jnp.sqrt(params["bn_rvar"] + params["bn_eps"])
    shift = (params["conv_b"] - params["bn_rmean"]) * scale + params["bn_beta"]
    cw = (params["conv_w"].reshape(C, 1) * scale).astype(jnp.float32)   # (C,1)
    shift_arr = jnp.reshape(shift, (1,)).astype(jnp.float32)            # SMEM

    fcw = params["fc_w"].T.astype(jnp.float32)                          # (HW, P)
    fcb = params["fc_b"].astype(jnp.float32)                            # (P,)
    if P_pad != P:
        fcw = jnp.pad(fcw, ((0, 0), (0, P_pad - P)))
        # Large negative finite (not -inf) so padded columns exp() to ~0
        # without inf-inf / NaN risk.
        fcb = jnp.pad(fcb, ((0, P_pad - P),), constant_values=-1e30)
    fcb = fcb.reshape(1, P_pad)

    # ---- explicit VMEM budget (double-buffered x/out + resident weights) --
    est = (2 * TN * C * HW * 4
           + 2 * TN * P_pad * 4
           + 2 * HW * P_pad * 4
           + 2 * (C + P_pad + 1) * 4)
    vmem_limit_bytes = int(min(max(2 * est, 32 * 1024 * 1024),
                               64 * 1024 * 1024))     # v7x-safe cap

    out = pl.pallas_call(
        policy_kernel,
        out_shape=jax.ShapeDtypeStruct((N_pad, P_pad), jnp.float32),
        grid=grid,
        in_specs=[
            # Streamed: one batch tile per grid step.
            pl.BlockSpec((TN, C, HW), lambda i: (i, 0, 0)),
            # Resident weights: index_map constant in the batch grid index.
            pl.BlockSpec((C, 1), lambda i: (0, 0)),
            pl.BlockSpec((HW, P_pad), lambda i: (0, 0)),
            pl.BlockSpec((1, P_pad), lambda i: (0, 0)),
            pl.BlockSpec(memory_space=pltpu.MemorySpace.SMEM),
        ],
        out_specs=pl.BlockSpec((TN, P_pad), lambda i: (i, 0)),
        compiler_params=pltpu.CompilerParams(
            dimension_semantics=("parallel",),        # megacore on v7x
            vmem_limit_bytes=vmem_limit_bytes,
        ),
    )(x3, cw, fcw, fcb, shift_arr)

    return out[:N, :P]


def reference_forward(x, params):
    """Pure-JAX mirror of the PyTorch module (eval-mode BN)."""
    P = params["outplanes"]
    y = jnp.einsum("nchw,c->nhw", x, params["conv_w"]) + params["conv_b"]
    y = (y - params["bn_rmean"]) / jnp.sqrt(params["bn_rvar"] + params["bn_eps"])
    y = y * params["bn_gamma"] + params["bn_beta"]
    y = jnp.maximum(y, 0.0)
    y = y.reshape(-1, P - 1)
    logits = y @ params["fc_w"].T + params["fc_b"]
    return jax.nn.softmax(logits, axis=1)


def make_params(key, inplanes, outplanes):
    k1, k2, k3, k4 = jax.random.split(key, 4)
    fan_in_fc = outplanes - 1
    bound = 1.0 / np.sqrt(fan_in_fc)
    return {
        "outplanes": outplanes,
        # Conv2d(inplanes, 1, kernel_size=1): weight (1, C, 1, 1) -> (C,)
        "conv_w": (jax.random.normal(k1, (inplanes,), jnp.float32)
                   / np.sqrt(inplanes)),
        "conv_b": jnp.float32(0.05),
        # BatchNorm2d(1) — inference-mode running stats + affine params.
        "bn_gamma": jnp.float32(1.0),
        "bn_beta": jnp.float32(0.0),
        "bn_rmean": jnp.float32(0.1),
        "bn_rvar": jnp.float32(1.5),
        "bn_eps": jnp.float32(1e-5),
        # Linear(outplanes-1, outplanes): weight (P, P-1), bias (P,)
        "fc_w": jax.random.uniform(k2, (outplanes, outplanes - 1),
                                   jnp.float32, -bound, bound),
        "fc_b": jax.random.uniform(k3, (outplanes,),
                                   jnp.float32, -bound, bound),
        "_input_key": k4,
    }


if __name__ == "__main__":
    # Small shapes consistent with the module: outplanes = H*W + 1.
    N, C, H, W = 2, 4, 8, 8
    inplanes = C
    outplanes = H * W + 1  # 65

    params = make_params(jax.random.PRNGKey(0), inplanes, outplanes)
    x = jax.random.normal(params["_input_key"], (N, C, H, W), jnp.float32)

    probas = policy_net_forward(x, params)
    probas = jax.block_until_ready(probas)

    ref = reference_forward(x, params)
    np.testing.assert_allclose(np.asarray(probas), np.asarray(ref),
                               rtol=5e-3, atol=1e-5)
    np.testing.assert_allclose(np.asarray(probas).sum(axis=1),
                               np.ones(N), rtol=0, atol=2e-3)

    # Second check: batch large enough to exercise multi-tile grid + padding.
    N2 = 300
    x2 = jax.random.normal(jax.random.PRNGKey(1), (N2, C, H, W), jnp.float32)
    probas2 = jax.block_until_ready(policy_net_forward(x2, params))
    ref2 = reference_forward(x2, params)
    np.testing.assert_allclose(np.asarray(probas2), np.asarray(ref2),
                               rtol=5e-3, atol=1e-5)

    print("KERNEL_OK")
</pallas_src>

<mosaic_0001>
module attributes {stable_mosaic.version = 11 : i64} {
  func.func @policy_kernel(%arg0: i32, %arg1: memref<8x4x64xf32, #tpu.memory_space<vmem>>, %arg2: memref<4x1xf32, #tpu.memory_space<vmem>>, %arg3: memref<64x128xf32, #tpu.memory_space<vmem>>, %arg4: memref<1x128xf32, #tpu.memory_space<vmem>>, %arg5: memref<1xf32, #tpu.memory_space<smem>>, %arg6: memref<8x128xf32, #tpu.memory_space<vmem>>) attributes {dimension_semantics = [#tpu.dimension_semantics<parallel>], iteration_bounds = array<i64: 1>, scalar_prefetch = 0 : i64, scratch_operands = 0 : i64, tpu.core_type = #tpu.core_type<tc>, window_params = [{transform_indices = @transform_0, window_bounds = array<i64: 8, 4, 64>}, {pipeline_mode = #tpu.pipeline_mode<synchronous>, transform_indices = @transform_1, window_bounds = array<i64: 4, 1>}, {pipeline_mode = #tpu.pipeline_mode<synchronous>, transform_indices = @transform_2, window_bounds = array<i64: 64, 128>}, {pipeline_mode = #tpu.pipeline_mode<synchronous>, transform_indices = @transform_3, window_bounds = array<i64: 1, 128>}, {transform_indices = @transform_4, window_bounds = array<i64: 1>}, {transform_indices = @transform_5, window_bounds = array<i64: 8, 128>}]} {
    %c0 = arith.constant 0 : index
    %c0_0 = arith.constant 0 : index
    %c0_1 = arith.constant 0 : index
    %0 = vector.load %arg1[%c0, %c0_0, %c0_1] : memref<8x4x64xf32, #tpu.memory_space<vmem>>, vector<8x4x64xf32>
    %c0_2 = arith.constant 0 : index
    %c0_3 = arith.constant 0 : index
    %1 = vector.load %arg2[%c0_2, %c0_3] : memref<4x1xf32, #tpu.memory_space<vmem>>, vector<4x1xf32>
    %c0_4 = arith.constant 0 : index
    %2 = memref.load %arg5[%c0_4] : memref<1xf32, #tpu.memory_space<smem>>
    %3 = vector.shape_cast %1 : vector<4x1xf32> to vector<1x4x1xf32>
    %4 = vector.broadcast %3 : vector<1x4x1xf32> to vector<8x4x64xf32>
    %5 = arith.mulf %0, %4 : vector<8x4x64xf32>
    %cst = arith.constant dense<0.000000e+00> : vector<8x64xf32>
    %6 = vector.multi_reduction <add>, %5, %cst [1] : vector<8x4x64xf32> to vector<8x64xf32>
    %7 = vector.broadcast %2 : f32 to vector<8x64xf32>
    %8 = arith.addf %6, %7 : vector<8x64xf32>
    %cst_5 = arith.constant 0.000000e+00 : f32
    %9 = vector.broadcast %cst_5 : f32 to vector<8x64xf32>
    %10 = arith.maximumf %8, %9 : vector<8x64xf32>
    %c0_6 = arith.constant 0 : index
    %c0_7 = arith.constant 0 : index
    %11 = vector.load %arg3[%c0_6, %c0_7] : memref<64x128xf32, #tpu.memory_space<vmem>>, vector<64x128xf32>
    %cst_8 = arith.constant dense<0.000000e+00> : vector<8x128xf32>
    %12 = tpu.matmul %10, %11, %cst_8 {dimension_numbers = #tpu.dot_dimension_numbers<[1], [0], [0], [1], [0, 0, 1, 1], [], []>} : vector<8x64xf32>, vector<64x128xf32>, vector<8x128xf32> -> vector<8x128xf32>
    %c0_9 = arith.constant 0 : index
    %c0_10 = arith.constant 0 : index
    %13 = vector.load %arg4[%c0_9, %c0_10] : memref<1x128xf32, #tpu.memory_space<vmem>>, vector<1x128xf32>
    %14 = vector.broadcast %13 : vector<1x128xf32> to vector<8x128xf32>
    %15 = arith.addf %12, %14 : vector<8x128xf32>
    %cst_11 = arith.constant dense<0xFF800000> : vector<8xf32>
    %16 = vector.multi_reduction <maximumf>, %15, %cst_11 [1] : vector<8x128xf32> to vector<8xf32>
    %17 = vector.shape_cast %16 : vector<8xf32> to vector<8x1xf32>
    %18 = vector.broadcast %17 : vector<8x1xf32> to vector<8x128xf32>
    %19 = arith.subf %15, %18 : vector<8x128xf32>
    %20 = math.exp %19 : vector<8x128xf32>
    %cst_12 = arith.constant dense<0.000000e+00> : vector<8xf32>
    %21 = vector.multi_reduction <add>, %20, %cst_12 [1] : vector<8x128xf32> to vector<8xf32>
    %22 = vector.shape_cast %21 : vector<8xf32> to vector<8x1xf32>
    %23 = tpu.reciprocal %22 {approx = true} : vector<8x1xf32> -> vector<8x1xf32>
    %24 = vector.broadcast %23 : vector<8x1xf32> to vector<8x128xf32>
    %25 = arith.mulf %20, %24 : vector<8x128xf32>
    %c0_13 = arith.constant 0 : index
    %c0_14 = arith.constant 0 : index
    %26 = vector.load %arg6[%c0_13, %c0_14] : memref<8x128xf32, #tpu.memory_space<vmem>>, vector<8x128xf32>
    tpu.vector_store %arg6[%c0_13, %c0_14], %25 {strides = array<i32>} : memref<8x128xf32, #tpu.memory_space<vmem>>, vector<8x128xf32>,
    return
  }
  func.func @transform_0(%arg0: i32) -> (i32, i32, i32) {
    %c0_i32 = arith.constant 0 : i32
    %c0_i32_0 = arith.constant 0 : i32
    %c0_i32_1 = arith.constant 0 : i32
    return %arg0, %c0_i32, %c0_i32_0 : i32, i32, i32
  }
  func.func @transform_1(%arg0: i32) -> (i32, i32) {
    %c0_i32 = arith.constant 0 : i32
    %c0_i32_0 = arith.constant 0 : i32
    %c0_i32_1 = arith.constant 0 : i32
    return %c0_i32, %c0_i32_0 : i32, i32
  }
  func.func @transform_2(%arg0: i32) -> (i32, i32) {
    %c0_i32 = arith.constant 0 : i32
    %c0_i32_0 = arith.constant 0 : i32
    %c0_i32_1 = arith.constant 0 : i32
    return %c0_i32, %c0_i32_0 : i32, i32
  }
  func.func @transform_3(%arg0: i32) -> (i32, i32) {
    %c0_i32 = arith.constant 0 : i32
    %c0_i32_0 = arith.constant 0 : i32
    %c0_i32_1 = arith.constant 0 : i32
    return %c0_i32, %c0_i32_0 : i32, i32
  }
  func.func @transform_4(%arg0: i32) -> i32 {
    %c0_i32 = arith.constant 0 : i32
    %c0_i32_0 = arith.constant 0 : i32
    return %c0_i32 : i32
  }
  func.func @transform_5(%arg0: i32) -> (i32, i32) {
    %c0_i32 = arith.constant 0 : i32
    %c0_i32_0 = arith.constant 0 : i32
    return %arg0, %c0_i32 : i32, i32
  }
}

</mosaic_0001>

<bundles_post_ra>
// kernel: tpu_custom_call.1
= control target key start
LH: loop header
LB: loop body
LE: loop exit
PB: predicated region body
PF: predicated region fallthrough
CT: control target
= control target key end

     0   :  { %11 = vsyncpa [#allocation4], 0  ;;  %s518_s0 = inlined_call_operand.hbm [shape: f32[8,4,64], index: 0, kind: input, shape index: {}]   ;;  %s519_s1 = inlined_call_operand.vmem [shape: f32[4,1], index: 1, kind: input, shape index: {}]   ;;  %s520_s2 = inlined_call_operand.hbm [shape: f32[64,128], index: 2, kind: input, shape index: {}]   ;;  %s521_s3 = inlined_call_operand.vmem [shape: f32[1,128], index: 3, kind: input, shape index: {}]   ;;  %s522_s4 = inlined_call_operand.<no memory space> [shape: f32[1], index: 4, kind: input, shape index: {}]   ;;  %s523_s5 = inlined_call_operand.hbm [shape: f32[8,128], index: 5, kind: output, shape index: {}]  }
   0x1   :  { %12 = vsyncpa [#allocation7], 0 }
   0x2   :  { %13 = vsyncpa [#allocation5], 0  ;;  %s413_s18 = smov [#allocation3]   ;;  %s341_s22 = scalar_lea.hbm %s518_s0, 512 }
   0x3   :  { %s19_s19 = sshll.u32 %s413_s18, 4  ;;  %p342_p0 = scmp.ne.s32.totalorder %s518_s0, %s341_s22  ;;  %s20_s19 = int_to_ptr.vmem [resolvable:$true] %s19_s19 }
   0x4   :  { %p345_p1 = scmp.lt.u32.totalorder %s341_s22, %s518_s0 }
   0x6   :  { %p347_p2 = pnand %p345_p1, %p342_p0 }
   0x8   :  { %350 = shalt.err (!%p347_p2)
}
   0x9   :  { %s351_s27 = scalar_lea.vmem %s20_s19, 512  ;;  %p356_p4 = scmp.lt.s32.totalorder %s20_s19, %s20_s19 }
   0xa   :  { %p352_p3 = scmp.ne.s32.totalorder %s20_s19, %s351_s27  ;;  %p357_p5 = scmp.lt.s32.totalorder %s351_s27, %s351_s27 }
   0xc   :  { %p358_p6 = por %p357_p5, %p356_p4 }
   0xe   :  { %p359_p7 = pnand %p358_p6, %p352_p3 }
  0x10   :  { %362 = shalt.err (!%p359_p7)
}
  0x11   :  { %s414_s28 = smov 64   ;;  %s415_s29 = smov 4  }
  0x12   :  { %25 = dma.hbm_to_vmem [thread:$0]  %s518_s0, 512, %s20_s19, [#allocation4], %s414_s28, %s414_s28, %s415_s29  }
  0x13   :  { %s416_s7 = smov [#allocation6]   ;;  %s363_s11 = scalar_lea.hbm %s520_s2, 1024 }
  0x14   :  { %s33_s8 = sshll.u32 %s416_s7, 4  ;;  %p364_p8 = scmp.ne.s32.totalorder %s520_s2, %s363_s11  ;;  %s34_s8 = int_to_ptr.vmem [resolvable:$true] %s33_s8 }
  0x15   :  { %p367_p9 = scmp.lt.u32.totalorder %s363_s11, %s520_s2 }
  0x17   :  { %p369_p10 = pnand %p367_p9, %p364_p8 }
  0x19   :  { %372 = shalt.err (!%p369_p10)
}
  0x1a   :  { %s373_s16 = scalar_lea.vmem %s34_s8, 1024  ;;  %p378_p12 = scmp.lt.s32.totalorder %s34_s8, %s34_s8 }
  0x1b   :  { %p374_p11 = scmp.ne.s32.totalorder %s34_s8, %s373_s16  ;;  %p379_p13 = scmp.lt.s32.totalorder %s373_s16, %s373_s16 }
  0x1d   :  { %p380_p0 = por %p379_p13, %p378_p12 }
  0x1f   :  { %p381_p1 = pnand %p380_p0, %p374_p11 }
  0x21   :  { %384 = shalt.err (!%p381_p1)
}
  0x22   :  { %s417_s0 = smov 128   ;;  %s418_s17 = smov 8  }
  0x23   :  { %39 = dma.hbm_to_vmem [thread:$0]  %s520_s2, 1024, %s34_s8, [#allocation7], %s417_s0, %s417_s0, %s418_s17  }
  0x24   :  { %407 = dma.done.wait [#allocation4], 512  }
  0x25   :  { %408 = vsyncadd [#allocation4], 4294966784 }
  0x26   :  { %409 = dma.done.wait [#allocation7], 1024  }
  0x27   :  { %410 = vsyncadd [#allocation7], 4294966272  ;;  %v419_v0 = vmov 0   ;;  %v58_v1 = vld [vmem:[%s519_s1] sm:$0xf]  ;;  %v148_v3 = vld [vmem:[#allocation6 + $0x8] sm:$0xff]  ;;  %v484_v25 = vstv %s522_s4 }
  0x28   :  { %336 = vset.pattern.permute.xlu0 %v419_v0  ;;  %v147_v2 = vld [vmem:[#allocation6] sm:$0xff]  ;;  %v149_v4 = vld [vmem:[#allocation6 + $0x10] sm:$0xff]  ;;  %v420_v5 = vmov 0.0|0.0   ;;  %v150_v7 = vld [vmem:[#allocation6 + $0x18] sm:$0xff]  ;;  %vm421_vm0 = vmmov 0   ;;  %v422_v8 = vmov 0.0  }
  0x29   :  { %62 = vperm.xlu0 %336, %v58_v1   ;;  %313 = vmatprep.subr.bf16.mxu0 %v420_v5  ;;  %v314_v6 = vpack.c.bf16 %v148_v3, %v147_v2  ;;  %v317_v9 = vpack.c.bf16 %v150_v7, %v149_v4  ;;  %v151_v10 = vld [vmem:[#allocation6 + $0x20] sm:$0xff]  ;;  %v152_v11 = vld [vmem:[#allocation6 + $0x28] sm:$0xff]  ;;  %v153_v13 = vld [vmem:[#allocation6 + $0x30] sm:$0xff]  ;;  %vm73_vm1 = vcmask 519168   ;;  %vm170_vm2 = vcmask 1041409   ;;  %s423_s23 = smov [#allocation8]  }
  0x2a   :  { %310 = vmatprep.mubr.msk.f32.mxu0 %vm421_vm0, %v422_v8  ;;  %v320_v12 = vpack.c.bf16 %v152_v11, %v151_v10  ;;  %v154_v14 = vld [vmem:[#allocation6 + $0x38] sm:$0xff]  ;;  %v50_v16 = vld [vmem:[#allocation3] sm:$0xf]  ;;  %v51_v17 = vld [vmem:[#allocation3 + $0x4] sm:$0xf]  ;;  %vm172_vm3 = vcmask 1042434  }
  0x2b   :  { %315 = vmatpush3.bf16.msra.mxu0 %v314_v6  ;;  %v323_v15 = vpack.c.bf16 %v154_v14, %v153_v13  ;;  %v52_v18 = vld [vmem:[#allocation3 + $0x8] sm:$0xf]  ;;  %v53_v19 = vld [vmem:[#allocation3 + $0xc] sm:$0xf]  ;;  %v54_v20 = vld [vmem:[#allocation3 + $0x10] sm:$0xf] }
  0x2c   :  { %316 = vmatprep.subr.bf16.mxu0 %v420_v5  ;;  %v55_v21 = vld [vmem:[#allocation3 + $0x14] sm:$0xf]  ;;  %v56_v22 = vld [vmem:[#allocation3 + $0x18] sm:$0xf]  ;;  %v57_v23 = vld [vmem:[#allocation3 + $0x1c] sm:$0xf] }
  0x2d   :  { %vm174_vm4 = vcmask 1043459   ;;  %vm176_vm5 = vcmask 1044484   ;;  %vm178_vm6 = vcmask 1045509   ;;  %vm180_vm7 = vcmask 1046534   ;;  %s273_s24 = sshll.u32 %s423_s23, 4  ;;  %s274_s24 = int_to_ptr.vmem [resolvable:$true] %s273_s24 }
  0x2e   :  { %vm182_vm8 = vcmask 1047559   ;;  %vm184_vm9 = vcmask 523264   ;;  %s385_s25 = scalar_lea.vmem %s274_s24, 128  ;;  %p390_p3 = scmp.lt.s32.totalorder %s274_s24, %s274_s24 }
  0x2f   :  { %318 = vmatpush3.bf16.msra.mxu0 %v317_v9  ;;  %p386_p2 = scmp.ne.s32.totalorder %s274_s24, %s385_s25  ;;  %p391_p4 = scmp.lt.s32.totalorder %s385_s25, %s385_s25 }
  0x30   :  { %319 = vmatprep.subr.bf16.mxu0 %v420_v5 }
  0x31   :  { %p392_p5 = por %p391_p4, %p390_p3 }
  0x33   :  { %321 = vmatpush3.bf16.msra.mxu0 %v320_v12  ;;  %p393_p6 = pnand %p392_p5, %p386_p2 }
  0x34   :  { %322 = vmatprep.subr.bf16.mxu0 %v420_v5 }
  0x37   :  { %324 = vmatpush3.bf16.msra.mxu0 %v323_v15 }
  0xa8   :  { %v63_v24 = vpop.permute.xlu0 %62 }
  0xa9   :  { %v65_v26 = vmul.f32 %v63_v24, %v50_v16  ;;  %v66_v27 = vmul.f32 %v63_v24, %v51_v17  ;;  %v67_v28 = vmul.f32 %v63_v24, %v52_v18  ;;  %v68_v29 = vmul.f32 %v63_v24, %v53_v19 }
  0xaa   :  { %v69_v30 = vmul.f32 %v63_v24, %v54_v20  ;;  %v70_v31 = vmul.f32 %v63_v24, %v55_v21  ;;  %v71_v32 = vmul.f32 %v63_v24, %v56_v22  ;;  %v72_v33 = vmul.f32 %v63_v24, %v57_v23 }
  0xab   :  { %v74_v34 = vsel %vm73_vm1, %v65_v26, 0.0  ;;  %v81_v35 = vsel %vm73_vm1, %v66_v27, 0.0  ;;  %v88_v36 = vsel %vm73_vm1, %v67_v28, 0.0  ;;  %v95_v37 = vsel %vm73_vm1, %v68_v29, 0.0 }
  0xac   :  { %v75_v38 = vrot.slane %v74_v34, 4  ;;  %v82_v39 = vrot.slane %v81_v35, 4  ;;  %v89_v40 = vrot.slane %v88_v36, 4  ;;  %v96_v41 = vrot.slane %v95_v37, 4 }
  0xad   :  { %v102_v42 = vsel %vm73_vm1, %v69_v30, 0.0  ;;  %v109_v43 = vsel %vm73_vm1, %v70_v31, 0.0  ;;  %v116_v44 = vsel %vm73_vm1, %v71_v32, 0.0  ;;  %v123_v45 = vsel %vm73_vm1, %v72_v33, 0.0 }
  0xae   :  { %v76_v46 = vadd.f32 %v75_v38, %v74_v34  ;;  %v83_v47 = vadd.f32 %v82_v39, %v81_v35  ;;  %v90_v48 = vadd.f32 %v89_v40, %v88_v36  ;;  %v97_v49 = vadd.f32 %v96_v41, %v95_v37 }
  0xaf   :  { %v103_v50 = vrot.slane %v102_v42, 4  ;;  %v110_v51 = vrot.slane %v109_v43, 4  ;;  %v117_v52 = vrot.slane %v116_v44, 4  ;;  %v124_v53 = vrot.slane %v123_v45, 4 }
  0xb0   :  { %v77_v54 = vrot.slane %v76_v46, 2  ;;  %v84_v55 = vrot.slane %v83_v47, 2  ;;  %v91_v56 = vrot.slane %v90_v48, 2  ;;  %v98_v57 = vrot.slane %v97_v49, 2 }
  0xb1   :  { %v104_v58 = vadd.f32 %v103_v50, %v102_v42  ;;  %v111_v59 = vadd.f32 %v110_v51, %v109_v43  ;;  %v118_v60 = vadd.f32 %v117_v52, %v116_v44  ;;  %v125_v61 = vadd.f32 %v124_v53, %v123_v45 }
  0xb2   :  { %v78_v62 = vadd.f32 %v77_v54, %v76_v46  ;;  %v85_v63 = vadd.f32 %v84_v55, %v83_v47  ;;  %v92_v0 = vadd.f32 %v91_v56, %v90_v48  ;;  %v99_v1 = vadd.f32 %v98_v57, %v97_v49 }
  0xb3   :  { %v105_v2 = vrot.slane %v104_v58, 2  ;;  %v112_v3 = vrot.slane %v111_v59, 2  ;;  %v119_v4 = vrot.slane %v118_v60, 2  ;;  %v126_v5 = vrot.slane %v125_v61, 2 }
  0xb4   :  { %v79_v6 = vrot.slane %v78_v62, 1  ;;  %v86_v7 = vrot.slane %v85_v63, 1  ;;  %v93_v8 = vrot.slane %v92_v0, 1  ;;  %v100_v9 = vrot.slane %v99_v1, 1 }
  0xb5   :  { %v106_v10 = vadd.f32 %v105_v2, %v104_v58  ;;  %v113_v11 = vadd.f32 %v112_v3, %v111_v59  ;;  %v120_v12 = vadd.f32 %v119_v4, %v118_v60  ;;  %v127_v13 = vadd.f32 %v126_v5, %v125_v61 }
  0xb6   :  { %v80_v14 = vadd.f32 %v79_v6, %v78_v62  ;;  %v87_v15 = vadd.f32 %v86_v7, %v85_v63  ;;  %v94_v16 = vadd.f32 %v93_v8, %v92_v0  ;;  %v101_v17 = vadd.f32 %v100_v9, %v99_v1 }
  0xb7   :  { %v107_v18 = vrot.slane %v106_v10, 1  ;;  %v114_v19 = vrot.slane %v113_v11, 1  ;;  %v121_v20 = vrot.slane %v120_v12, 1  ;;  %v128_v21 = vrot.slane %v127_v13, 1 }
  0xb8   :  { %v131_v22 = vadd.f32 %v484_v25, %v80_v14  ;;  %v132_v23 = vadd.f32 %v484_v25, %v87_v15  ;;  %v133_v24 = vadd.f32 %v484_v25, %v94_v16  ;;  %v134_v26 = vadd.f32 %v484_v25, %v101_v17 }
  0xb9   :  { %v108_v27 = vadd.f32 %v107_v18, %v106_v10  ;;  %v115_v28 = vadd.f32 %v114_v19, %v113_v11  ;;  %v122_v29 = vadd.f32 %v121_v20, %v120_v12  ;;  %v129_v30 = vadd.f32 %v128_v21, %v127_v13 }
  0xba   :  { %v139_v31 = vmax.f32 %v131_v22, 0.0  ;;  %v140_v32 = vmax.f32 %v132_v23, 0.0  ;;  %v141_v33 = vmax.f32 %v133_v24, 0.0  ;;  %v142_v39 = vmax.f32 %v134_v26, 0.0 }
  0xbb   :  { %v135_v34 = vadd.f32 %v484_v25, %v108_v27  ;;  %v136_v35 = vadd.f32 %v484_v25, %v115_v28  ;;  %v137_v36 = vadd.f32 %v484_v25, %v122_v29  ;;  %v138_v38 = vadd.f32 %v484_v25, %v129_v30  ;;  %v283_v25 = vld [vmem:[%s521_s3] ss:$0 sm:$0xff] }
  0xbc   :  { %v171_v37 = vsel %vm170_vm2, %v140_v32, %v139_v31 }
  0xbd   :  { %v143_v40 = vmax.f32 %v135_v34, 0.0  ;;  %v173_v41 = vsel %vm172_vm3, %v141_v33, %v171_v37  ;;  %v144_v42 = vmax.f32 %v136_v35, 0.0  ;;  %v145_v44 = vmax.f32 %v137_v36, 0.0 }
  0xbe   :  { %v175_v43 = vsel %vm174_vm4, %v142_v39, %v173_v41  ;;  %v146_v46 = vmax.f32 %v138_v38, 0.0 }
  0xbf   :  { %v177_v45 = vsel %vm176_vm5, %v143_v40, %v175_v43 }
  0xc0   :  { %v179_v47 = vsel %vm178_vm6, %v144_v42, %v177_v45 }
  0xc1   :  { %v181_v48 = vsel %vm180_vm7, %v145_v44, %v179_v47 }
  0xc2   :  { %v183_v49 = vsel %vm182_vm8, %v146_v46, %v181_v48 }
  0xc3   :  { %311 = vmatmul.mubr.msk.f32.vlgmr.msra.gmra.mrb[0].mxu0 %vm184_vm9, %v183_v49 }
 0x196   :  { %v253_v50 = vpop.f32.mrb[0].mxu0 }
 0x197   :  { %v254_v51 = vadd.f32 %v283_v25, %v253_v50  ;;  %v312_v52 = vpop.f32.mrb[1].mxu0 }
 0x199   :  { %257 = vmax.xlane.f32.xlu0 %v254_v51 }
 0x226   :  { %v258_v53 = vpop.xlane.xlu0 %257 }
 0x227   :  { %v259_v54 = vsub.f32 %v254_v51, %v258_v53 }
 0x229   :  { %v260_v55 = vmul.f32 1.442695, %v259_v54 }
 0x22b   :  { %337 = vpow2.f32 %v260_v55 }
 0x235   :  { %v338_v56 = vpop.eup %337 }
 0x236   :  { %262 = vadd.xlane.f32.xlu1 %v338_v56 }
 0x2c3   :  { %v263_v57 = vpop.xlane.xlu1 %262 }
 0x2c4   :  { %339 = vrcp.f32 %v263_v57 }
 0x2ce   :  { %v340_v58 = vpop.eup %339 }
 0x2cf   :  { %v265_v59 = vmul.f32 %v340_v58, %v338_v56 }
 0x2d1   :  { %266 = vst [vmem:[#allocation8] sm:$0xff] %v265_v59 }
 0x2d2   :  { %396 = shalt.err (!%p393_p6)
}
 0x2d3   :  { %s397_s27 = scalar_lea.hbm %s523_s5, 128 }
 0x2d4   :  { %p398_p7 = scmp.ne.s32.totalorder %s523_s5, %s397_s27  ;;  %p401_p8 = scmp.lt.u32.totalorder %s397_s27, %s523_s5 }
 0x2d6   :  { %p403_p9 = pnand %p401_p8, %p398_p7 }
 0x2d8   :  { %406 = shalt.err (!%p403_p9)
}
 0x2d9   :  { %276 = dma.vmem_to_hbm [thread:$0]  %s274_s24, 128, %s523_s5, [#allocation5]  }
 0x2da   :  { %411 = dma.done.wait [#allocation5], 128  }
 0x2db   :  { %412 = vsyncadd [#allocation5], 4294967168 }
 0x2dc   :  { %280 = vsyncpa [#allocation4], 1 }
 0x2dd   :  { %281 = vsyncpa [#allocation7], 1 }
 0x2de   :  { %282 = vsyncpa [#allocation5], 1 }

</bundles_post_ra>
